<compile_context>
chip_gen: v6e
topology: v6e:2x2x1
jax: 0.10.0
libtpu: 0.0.40
codegen_flags: <defaults>
</compile_context>

<pallas_src>
import jax
import jax.numpy as jnp
from jax import lax
from jax.experimental import pallas as pl
from jax.experimental.pallas import tpu as pltpu


def _round_up(x, m):
    return ((x + m - 1) // m) * m


def _make_vq_kernel(hw, t_size, padded):
    """Kernel over one (C, T) column-tile of the NCHW-flat input."""

    def kernel(x_ref, e_ref, et_ref, esq_ref,
               quant_ref, idx_ref, sse_ref, cnt_ref):
        t = pl.program_id(1)

        @pl.when(t == 0)
        def _init():
            sse_ref[...] = jnp.zeros_like(sse_ref)
            cnt_ref[...] = jnp.zeros_like(cnt_ref)

        x = x_ref[...]                     # (D, T)  one column per flat vector
        e = e_ref[...]                     # (K, D)  resident codebook
        et = et_ref[...]                   # (D, K)  resident codebook^T
        e_sq = esq_ref[...]                # (K, 1)  precomputed ||e_k||^2

        kk = e.shape[0]
        tt = x.shape[1]

        # argmin_k ||x - e_k||^2 == argmin_k (||e_k||^2 - 2 e_k.x)
        xe = jnp.dot(e, x, preferred_element_type=jnp.float32)      # (K, T) MXU
        dist = e_sq - 2.0 * xe                                       # (K, T)

        # first-index argmin along K (matches torch/jnp argmin tie-break)
        row = lax.broadcasted_iota(jnp.int32, (kk, tt), 0)
        min_d = jnp.min(dist, axis=0, keepdims=True)                 # (1, T)
        idx = jnp.min(jnp.where(dist == min_d, row, kk),
                      axis=0, keepdims=True)                         # (1, T) i32
        enc = (row == idx).astype(jnp.float32)                       # (K, T)

        if padded:
            # zero out one-hots of padded columns so counts / sse stay exact
            col = (t * t_size
                   + lax.broadcasted_iota(jnp.int32, (1, tt), 1))    # (1, T)
            enc = enc * (col < hw).astype(jnp.float32)

        # quantized columns = codebook^T @ one-hot                    (D, T) MXU
        quant = jnp.dot(et, enc, preferred_element_type=jnp.float32)

        quant_ref[...] = quant.astype(quant_ref.dtype)
        idx_ref[...] = idx

        # cross-tile reductions (finalized in the wrapper)
        diff = quant - x                     # padded cols: 0 - 0 = 0
        tile_sse = jnp.sum(jnp.sum(diff * diff, axis=1, keepdims=True),
                           axis=0, keepdims=True)                    # (1, 1)
        sse_ref[...] = sse_ref[...] + tile_sse
        cnt_ref[...] = cnt_ref[...] + jnp.sum(enc, axis=1, keepdims=True)

    return kernel


def vector_quantizer_ema_forward(x_nchw, embedding, commitment_cost,
                                 hw_tile=1024):
    """x_nchw: (B, C, H, W) float32; embedding: (K, D) with D == C."""
    B, C, H, W = x_nchw.shape
    K, D = embedding.shape
    assert C == D
    HW = H * W
    N = B * HW

    # pick a lane-dense tile along H*W (multiple of 128), pad-and-mask the rest
    T = max(128, min(_round_up(hw_tile, 128), _round_up(HW, 128)))
    HWp = _round_up(HW, T)
    padded = HWp != HW

    x3 = x_nchw.reshape(B, C, HW).astype(jnp.float32)   # free reshape (NCHW)
    if padded:
        x3 = jnp.pad(x3, ((0, 0), (0, 0), (0, HWp - HW)))

    emb = embedding.astype(jnp.float32)                  # (K, D)
    emb_t = emb.T                                        # (D, K), tiny, one-off
    e_sq = jnp.sum(emb * emb, axis=1, keepdims=True)     # (K, 1)

    grid = (B, HWp // T)

    out_shapes = (
        jax.ShapeDtypeStruct((B, C, HWp), jnp.float32),  # quantized (NCHW-flat)
        jax.ShapeDtypeStruct((B, 1, HWp), jnp.int32),    # argmin indices
        jax.ShapeDtypeStruct((B, 1, 1), jnp.float32),    # per-b sum sq. error
        jax.ShapeDtypeStruct((B, K, 1), jnp.float32),    # per-b codeword counts
    )

    quant3, idx3, sse, cnt = pl.pallas_call(
        _make_vq_kernel(HW, T, padded),
        out_shape=out_shapes,
        grid=grid,
        in_specs=[
            pl.BlockSpec((None, C, T), lambda b, t: (b, 0, t)),  # x tile
            pl.BlockSpec((K, D), lambda b, t: (0, 0)),           # codebook
            pl.BlockSpec((D, K), lambda b, t: (0, 0)),           # codebook^T
            pl.BlockSpec((K, 1), lambda b, t: (0, 0)),           # ||e||^2
        ],
        out_specs=(
            pl.BlockSpec((None, C, T), lambda b, t: (b, 0, t)),  # quant tile
            pl.BlockSpec((None, 1, T), lambda b, t: (b, 0, t)),  # indices tile
            pl.BlockSpec((None, 1, 1), lambda b, t: (b, 0, 0)),  # sse acc (per b)
            pl.BlockSpec((None, K, 1), lambda b, t: (b, 0, 0)),  # cnt acc (per b)
        ),
        compiler_params=pltpu.CompilerParams(
            dimension_semantics=("parallel", "arbitrary")),
    )(x3, emb, emb_t, e_sq)

    # finalization (tiny, outside the hot loop)
    if padded:
        quant3 = quant3[:, :, :HW]
        idx3 = idx3[:, :, :HW]
    quant_nchw = quant3.reshape(B, C, H, W)

    idx_flat = idx3.reshape(N)                            # (b, h*W + w) order
    encodings = jax.nn.one_hot(idx_flat, K, dtype=jnp.float32)   # (N, K)

    sse_total = jnp.sum(sse)
    counts = jnp.sum(cnt[:, :, 0], axis=0)                # (K,)

    loss = commitment_cost * sse_total / jnp.float32(N * D)
    avg_probs = counts / jnp.float32(N)
    perplexity = jnp.exp(-jnp.sum(avg_probs * jnp.log(avg_probs + 1e-10)))

    # straight-through output equals quant numerically in the forward pass
    return loss, quant_nchw, perplexity, encodings


def _reference(x_nchw, embedding, commitment_cost):
    B, C, H, W = x_nchw.shape
    flat = jnp.transpose(x_nchw, (0, 2, 3, 1)).reshape(-1, C)
    dist = (jnp.sum(flat ** 2, 1, keepdims=True) + jnp.sum(embedding ** 2, 1)
            - 2.0 * flat @ embedding.T)
    idx = jnp.argmin(dist, axis=1)
    enc = jax.nn.one_hot(idx, embedding.shape[0], dtype=jnp.float32)
    quant = enc @ embedding
    loss = commitment_cost * jnp.mean((quant - flat) ** 2)
    avg = jnp.mean(enc, axis=0)
    perp = jnp.exp(-jnp.sum(avg * jnp.log(avg + 1e-10)))
    quant_nchw = jnp.transpose(quant.reshape(B, H, W, C), (0, 3, 1, 2))
    return loss, quant_nchw, perp, enc


if __name__ == "__main__":
    # Module hyperparameters (small, TPU-friendly)
    num_embeddings = 64      # K
    embedding_dim = 32       # D (== channel count C)
    commitment_cost = 0.25
    # decay / epsilon only matter in training-mode EMA updates (not run here)

    B, H, W = 2, 16, 16      # N = B*H*W = 512 flat vectors, H*W = 256

    key = jax.random.PRNGKey(0)
    kx, ke = jax.random.split(key)
    x = jax.random.normal(kx, (B, embedding_dim, H, W), dtype=jnp.float32)
    # embedding.weight.data.normal_() -> deterministic normal init
    embedding = jax.random.normal(ke, (num_embeddings, embedding_dim),
                                  dtype=jnp.float32)

    # hw_tile=128 -> grid=(2, 2): exercises both the parallel B axis and the
    # cross-tile accumulator path along the inner "arbitrary" axis
    loss, quant, perp, enc = vector_quantizer_ema_forward(
        x, embedding, commitment_cost, hw_tile=128)
    jax.block_until_ready((loss, quant, perp, enc))

    # sanity-check against a plain-JAX reference
    rloss, rquant, rperp, renc = _reference(x, embedding, commitment_cost)
    assert jnp.allclose(loss, rloss, atol=1e-5, rtol=1e-5)
    assert jnp.allclose(quant, rquant, atol=1e-5, rtol=1e-5)
    assert jnp.allclose(perp, rperp, atol=1e-4, rtol=1e-4)
    assert jnp.allclose(enc, renc)

    print("KERNEL_OK")
</pallas_src>

<mosaic_0001>
module attributes {stable_mosaic.version = 11 : i64} {
  func.func @kernel(%arg0: i32, %arg1: i32, %arg2: memref<1x32x128xf32, #tpu.memory_space<vmem>>, %arg3: memref<64x32xf32, #tpu.memory_space<vmem>>, %arg4: memref<32x64xf32, #tpu.memory_space<vmem>>, %arg5: memref<64x1xf32, #tpu.memory_space<vmem>>, %arg6: memref<1x32x128xf32, #tpu.memory_space<vmem>>, %arg7: memref<1x1x128xi32, #tpu.memory_space<vmem>>, %arg8: memref<1x1x1xf32, #tpu.memory_space<vmem>>, %arg9: memref<1x64x1xf32, #tpu.memory_space<vmem>>) attributes {dimension_semantics = [#tpu.dimension_semantics<parallel>, #tpu.dimension_semantics<arbitrary>], iteration_bounds = array<i64: 2, 2>, scalar_prefetch = 0 : i64, scratch_operands = 0 : i64, tpu.core_type = #tpu.core_type<tc>, window_params = [{transform_indices = @transform_0, window_bounds = array<i64: 1, 32, 128>}, {pipeline_mode = #tpu.pipeline_mode<synchronous>, transform_indices = @transform_1, window_bounds = array<i64: 64, 32>}, {pipeline_mode = #tpu.pipeline_mode<synchronous>, transform_indices = @transform_2, window_bounds = array<i64: 32, 64>}, {pipeline_mode = #tpu.pipeline_mode<synchronous>, transform_indices = @transform_3, window_bounds = array<i64: 64, 1>}, {transform_indices = @transform_4, window_bounds = array<i64: 1, 32, 128>}, {transform_indices = @transform_5, window_bounds = array<i64: 1, 1, 128>}, {transform_indices = @transform_6, window_bounds = array<i64: 1, 1, 1>}, {transform_indices = @transform_7, window_bounds = array<i64: 1, 64, 1>}]} {
    %c0_i32 = arith.constant 0 : i32
    %0 = arith.cmpi eq, %arg1, %c0_i32 : i32
    %1 = arith.extui %0 : i1 to i32
    %c0_i32_0 = arith.constant 0 : i32
    %2 = arith.cmpi ne, %1, %c0_i32_0 : i32
    scf.if %2 {
      %cst_34 = arith.constant 0.000000e+00 : f32
      %53 = vector.broadcast %cst_34 : f32 to vector<1x1xf32>
      %c0_35 = arith.constant 0 : index
      %c0_36 = arith.constant 0 : index
      %c0_37 = arith.constant 0 : index
      %54 = vector.load %arg8[%c0_35, %c0_36, %c0_37] : memref<1x1x1xf32, #tpu.memory_space<vmem>>, vector<1x1x1xf32>
      %55 = vector.shape_cast %54 : vector<1x1x1xf32> to vector<1x1xf32>
      %56 = vector.shape_cast %53 : vector<1x1xf32> to vector<1x1x1xf32>
      tpu.vector_store %arg8[%c0_35, %c0_36, %c0_37], %56 {strides = array<i32>} : memref<1x1x1xf32, #tpu.memory_space<vmem>>, vector<1x1x1xf32>,
      %cst_38 = arith.constant 0.000000e+00 : f32
      %57 = vector.broadcast %cst_38 : f32 to vector<64x1xf32>
      %c0_39 = arith.constant 0 : index
      %c0_40 = arith.constant 0 : index
      %c0_41 = arith.constant 0 : index
      %58 = vector.load %arg9[%c0_39, %c0_40, %c0_41] : memref<1x64x1xf32, #tpu.memory_space<vmem>>, vector<1x64x1xf32>
      %59 = vector.shape_cast %58 : vector<1x64x1xf32> to vector<64x1xf32>
      %60 = vector.shape_cast %57 : vector<64x1xf32> to vector<1x64x1xf32>
      tpu.vector_store %arg9[%c0_39, %c0_40, %c0_41], %60 {strides = array<i32>} : memref<1x64x1xf32, #tpu.memory_space<vmem>>, vector<1x64x1xf32>,
    } else {
    }
    %c0 = arith.constant 0 : index
    %c0_1 = arith.constant 0 : index
    %c0_2 = arith.constant 0 : index
    %3 = vector.load %arg2[%c0, %c0_1, %c0_2] : memref<1x32x128xf32, #tpu.memory_space<vmem>>, vector<1x32x128xf32>
    %4 = vector.shape_cast %3 : vector<1x32x128xf32> to vector<32x128xf32>
    %c0_3 = arith.constant 0 : index
    %c0_4 = arith.constant 0 : index
    %5 = vector.load %arg3[%c0_3, %c0_4] : memref<64x32xf32, #tpu.memory_space<vmem>>, vector<64x32xf32>
    %c0_5 = arith.constant 0 : index
    %c0_6 = arith.constant 0 : index
    %6 = vector.load %arg4[%c0_5, %c0_6] : memref<32x64xf32, #tpu.memory_space<vmem>>, vector<32x64xf32>
    %c0_7 = arith.constant 0 : index
    %c0_8 = arith.constant 0 : index
    %7 = vector.load %arg5[%c0_7, %c0_8] : memref<64x1xf32, #tpu.memory_space<vmem>>, vector<64x1xf32>
    %cst = arith.constant dense<0.000000e+00> : vector<64x128xf32>
    %8 = tpu.matmul %5, %4, %cst {dimension_numbers = #tpu.dot_dimension_numbers<[1], [0], [0], [1], [0, 0, 1, 1], [], []>} : vector<64x32xf32>, vector<32x128xf32>, vector<64x128xf32> -> vector<64x128xf32>
    %cst_9 = arith.constant 2.000000e+00 : f32
    %9 = vector.broadcast %cst_9 : f32 to vector<64x128xf32>
    %10 = arith.mulf %9, %8 : vector<64x128xf32>
    %11 = vector.broadcast %7 : vector<64x1xf32> to vector<64x128xf32>
    %12 = arith.subf %11, %10 : vector<64x128xf32>
    %13 = tpu.iota {dimensions = array<i32: 0>} : vector<64x128xi32>
    %cst_10 = arith.constant dense<0x7F800000> : vector<128xf32>
    %14 = vector.multi_reduction <minimumf>, %12, %cst_10 [0] : vector<64x128xf32> to vector<128xf32>
    %15 = vector.shape_cast %14 : vector<128xf32> to vector<1x128xf32>
    %16 = vector.broadcast %15 : vector<1x128xf32> to vector<64x128xf32>
    %17 = arith.cmpf oeq, %12, %16 : vector<64x128xf32>
    %c64_i32 = arith.constant 64 : i32
    %18 = vector.broadcast %c64_i32 : i32 to vector<64x128xi32>
    %19 = arith.select %17, %13, %18 : vector<64x128xi1>, vector<64x128xi32>
    %cst_11 = arith.constant dense<2147483647> : vector<128xi32>
    %20 = vector.multi_reduction <minsi>, %19, %cst_11 [0] : vector<64x128xi32> to vector<128xi32>
    %21 = vector.shape_cast %20 : vector<128xi32> to vector<1x128xi32>
    %22 = vector.broadcast %21 : vector<1x128xi32> to vector<64x128xi32>
    %23 = arith.cmpi eq, %13, %22 : vector<64x128xi32>
    %24 = arith.extui %23 : vector<64x128xi1> to vector<64x128xi32>
    %25 = arith.sitofp %24 : vector<64x128xi32> to vector<64x128xf32>
    %cst_12 = arith.constant dense<0.000000e+00> : vector<32x128xf32>
    %26 = tpu.matmul %6, %25, %cst_12 {dimension_numbers = #tpu.dot_dimension_numbers<[1], [0], [0], [1], [0, 0, 1, 1], [], []>} : vector<32x64xf32>, vector<64x128xf32>, vector<32x128xf32> -> vector<32x128xf32>
    %c0_13 = arith.constant 0 : index
    %c0_14 = arith.constant 0 : index
    %c0_15 = arith.constant 0 : index
    %27 = vector.load %arg6[%c0_13, %c0_14, %c0_15] : memref<1x32x128xf32, #tpu.memory_space<vmem>>, vector<1x32x128xf32>
    %28 = vector.shape_cast %27 : vector<1x32x128xf32> to vector<32x128xf32>
    %29 = vector.shape_cast %26 : vector<32x128xf32> to vector<1x32x128xf32>
    tpu.vector_store %arg6[%c0_13, %c0_14, %c0_15], %29 {strides = array<i32>} : memref<1x32x128xf32, #tpu.memory_space<vmem>>, vector<1x32x128xf32>,
    %c0_16 = arith.constant 0 : index
    %c0_17 = arith.constant 0 : index
    %c0_18 = arith.constant 0 : index
    %30 = vector.load %arg7[%c0_16, %c0_17, %c0_18] : memref<1x1x128xi32, #tpu.memory_space<vmem>>, vector<1x1x128xi32>
    %31 = vector.shape_cast %30 : vector<1x1x128xi32> to vector<1x128xi32>
    %32 = vector.shape_cast %21 : vector<1x128xi32> to vector<1x1x128xi32>
    tpu.vector_store %arg7[%c0_16, %c0_17, %c0_18], %32 {strides = array<i32>} : memref<1x1x128xi32, #tpu.memory_space<vmem>>, vector<1x1x128xi32>,
    %33 = arith.subf %26, %4 : vector<32x128xf32>
    %34 = arith.mulf %33, %33 : vector<32x128xf32>
    %cst_19 = arith.constant dense<0.000000e+00> : vector<32xf32>
    %35 = vector.multi_reduction <add>, %34, %cst_19 [1] : vector<32x128xf32> to vector<32xf32>
    %36 = vector.shape_cast %35 : vector<32xf32> to vector<32x1xf32>
    %cst_20 = arith.constant dense<0.000000e+00> : vector<1xf32>
    %37 = vector.multi_reduction <add>, %36, %cst_20 [0] : vector<32x1xf32> to vector<1xf32>
    %38 = vector.shape_cast %37 : vector<1xf32> to vector<1x1xf32>
    %c0_21 = arith.constant 0 : index
    %c0_22 = arith.constant 0 : index
    %c0_23 = arith.constant 0 : index
    %39 = vector.load %arg8[%c0_21, %c0_22, %c0_23] : memref<1x1x1xf32, #tpu.memory_space<vmem>>, vector<1x1x1xf32>
    %40 = vector.shape_cast %39 : vector<1x1x1xf32> to vector<1x1xf32>
    %41 = arith.addf %40, %38 : vector<1x1xf32>
    %c0_24 = arith.constant 0 : index
    %c0_25 = arith.constant 0 : index
    %c0_26 = arith.constant 0 : index
    %42 = vector.load %arg8[%c0_24, %c0_25, %c0_26] : memref<1x1x1xf32, #tpu.memory_space<vmem>>, vector<1x1x1xf32>
    %43 = vector.shape_cast %42 : vector<1x1x1xf32> to vector<1x1xf32>
    %44 = vector.shape_cast %41 : vector<1x1xf32> to vector<1x1x1xf32>
    tpu.vector_store %arg8[%c0_24, %c0_25, %c0_26], %44 {strides = array<i32>} : memref<1x1x1xf32, #tpu.memory_space<vmem>>, vector<1x1x1xf32>,
    %c0_27 = arith.constant 0 : index
    %c0_28 = arith.constant 0 : index
    %c0_29 = arith.constant 0 : index
    %45 = vector.load %arg9[%c0_27, %c0_28, %c0_29] : memref<1x64x1xf32, #tpu.memory_space<vmem>>, vector<1x64x1xf32>
    %46 = vector.shape_cast %45 : vector<1x64x1xf32> to vector<64x1xf32>
    %cst_30 = arith.constant dense<0.000000e+00> : vector<64xf32>
    %47 = vector.multi_reduction <add>, %25, %cst_30 [1] : vector<64x128xf32> to vector<64xf32>
    %48 = vector.shape_cast %47 : vector<64xf32> to vector<64x1xf32>
    %49 = arith.addf %46, %48 : vector<64x1xf32>
    %c0_31 = arith.constant 0 : index
    %c0_32 = arith.constant 0 : index
    %c0_33 = arith.constant 0 : index
    %50 = vector.load %arg9[%c0_31, %c0_32, %c0_33] : memref<1x64x1xf32, #tpu.memory_space<vmem>>, vector<1x64x1xf32>
    %51 = vector.shape_cast %50 : vector<1x64x1xf32> to vector<64x1xf32>
    %52 = vector.shape_cast %49 : vector<64x1xf32> to vector<1x64x1xf32>
    tpu.vector_store %arg9[%c0_31, %c0_32, %c0_33], %52 {strides = array<i32>} : memref<1x64x1xf32, #tpu.memory_space<vmem>>, vector<1x64x1xf32>,
    return
  }
  func.func @transform_0(%arg0: i32, %arg1: i32) -> (i32, i32, i32) {
    %c0_i32 = arith.constant 0 : i32
    %c0_i32_0 = arith.constant 0 : i32
    return %arg0, %c0_i32, %arg1 : i32, i32, i32
  }
  func.func @transform_1(%arg0: i32, %arg1: i32) -> (i32, i32) {
    %c0_i32 = arith.constant 0 : i32
    %c0_i32_0 = arith.constant 0 : i32
    %c0_i32_1 = arith.constant 0 : i32
    return %c0_i32, %c0_i32_0 : i32, i32
  }
  func.func @transform_2(%arg0: i32, %arg1: i32) -> (i32, i32) {
    %c0_i32 = arith.constant 0 : i32
    %c0_i32_0 = arith.constant 0 : i32
    %c0_i32_1 = arith.constant 0 : i32
    return %c0_i32, %c0_i32_0 : i32, i32
  }
  func.func @transform_3(%arg0: i32, %arg1: i32) -> (i32, i32) {
    %c0_i32 = arith.constant 0 : i32
    %c0_i32_0 = arith.constant 0 : i32
    %c0_i32_1 = arith.constant 0 : i32
    return %c0_i32, %c0_i32_0 : i32, i32
  }
  func.func @transform_4(%arg0: i32, %arg1: i32) -> (i32, i32, i32) {
    %c0_i32 = arith.constant 0 : i32
    %c0_i32_0 = arith.constant 0 : i32
    return %arg0, %c0_i32, %arg1 : i32, i32, i32
  }
  func.func @transform_5(%arg0: i32, %arg1: i32) -> (i32, i32, i32) {
    %c0_i32 = arith.constant 0 : i32
    %c0_i32_0 = arith.constant 0 : i32
    return %arg0, %c0_i32, %arg1 : i32, i32, i32
  }
  func.func @transform_6(%arg0: i32, %arg1: i32) -> (i32, i32, i32) {
    %c0_i32 = arith.constant 0 : i32
    %c0_i32_0 = arith.constant 0 : i32
    %c0_i32_1 = arith.constant 0 : i32
    return %arg0, %c0_i32, %c0_i32_0 : i32, i32, i32
  }
  func.func @transform_7(%arg0: i32, %arg1: i32) -> (i32, i32, i32) {
    %c0_i32 = arith.constant 0 : i32
    %c0_i32_0 = arith.constant 0 : i32
    %c0_i32_1 = arith.constant 0 : i32
    return %arg0, %c0_i32, %c0_i32_0 : i32, i32, i32
  }
}

</mosaic_0001>

<bundles_post_ra>
// kernel: tpu_custom_call.1
= control target key start
LH: loop header
LB: loop body
LE: loop exit
PB: predicated region body
PF: predicated region fallthrough
CT: control target
= control target key end

     0   :  { %s1885_s0 = inlined_call_operand.vmem [shape: f32[2,32,256], index: 0, kind: input, shape index: {}]   ;;  %s1886_s1 = inlined_call_operand.vmem [shape: f32[64,32], index: 1, kind: input, shape index: {}]   ;;  %s1887_s2 = inlined_call_operand.vmem [shape: f32[32,64], index: 2, kind: input, shape index: {}]   ;;  %s1888_s3 = inlined_call_operand.vmem [shape: f32[64,1], index: 3, kind: input, shape index: {}]   ;;  %s1889_s4 = inlined_call_operand.hbm [shape: f32[2,32,256], index: 4, kind: output, shape index: {0}]   ;;  %s1890_s5 = inlined_call_operand.hbm [shape: s32[2,1,256], index: 5, kind: output, shape index: {1}]   ;;  %s1891_s6 = inlined_call_operand.vmem [shape: f32[2,1,1], index: 6, kind: output, shape index: {2}]   ;;  %s1892_s7 = inlined_call_operand.vmem [shape: f32[2,64,1], index: 7, kind: output, shape index: {3}]  }
   0x1   :  { %1896 = sst [smem:[#allocation11_spill]] %s1885_s0 }
   0x2   :  { %1897 = sst [smem:[#allocation12_spill]] %s1886_s1 }
   0x3   :  { %1898 = sst [smem:[#allocation13_spill]] %s1887_s2 }
   0x4   :  { %1899 = sst [smem:[#allocation14_spill]] %s1888_s3 }
   0x5   :  { %1900 = sst [smem:[#allocation15_spill]] %s1889_s4 }
   0x6   :  { %1901 = sst [smem:[#allocation16_spill]] %s1891_s6 }
   0x7   :  { %1902 = sst [smem:[#allocation17_spill]] %s1892_s7 }
   0x8   :  { %13 = vsyncpa [#allocation4], 0 }
   0x9   :  { %15 = vsyncpa [#allocation4 + $0x1], 0 }
   0xa   :  { %16 = vsyncpa [#allocation6], 0 }
   0xb   :  { %18 = vsyncpa [#allocation6 + $0x1], 0  ;;  %s1435_s24 = smov 0   ;;  %s1437_s25 = smov 0  }
   0xc   :  { %s1439_s26 = smov 0   ;;  %s1441_s27 = smov 0  }
   0xd   :  { %s1443_s28 = smov 0   ;;  %s1445_s29 = smov 0  }
   0xe   :  { %s1447_s30 = smov 0   ;;  %s1449_s8 = smov 0  }
   0xf LB: > { %s1062_s9 = sadd.s32 4294967295, %s1384_s8   ;;  %s1063_s10 = sadd.s32 4294967294, %s1384_s8   ;;  %s1384_s8 = sphi %s1449_s8, %s24_s8   ;;  %s1380_s30 = sphi %s1447_s30, %s1924_s30   ;;  %s1376_s29 = sphi %s1445_s29, %s1923_s29   ;;  %s1372_s28 = sphi %s1443_s28, %s1922_s28   ;;  %s1368_s27 = sphi %s1441_s27, %s1921_s27   ;;  %s1364_s26 = sphi %s1439_s26, %s1920_s26   ;;  %s1360_s25 = sphi %s1437_s25, %s1919_s25   ;;  %s1356_s24 = sphi %s1435_s24, %s1918_s24  }
  0x10   : > { %s33_s11 = sadd.s32 1, %s1376_s29  ;;  %s36_s12 = sadd.s32 1, %s1380_s30 }
  0x11   : > { %p34_p0 = scmp.ge.s32.totalorder %s33_s11, 2  ;;  %p52_p1 = scmp.ne.s32.totalorder %s1364_s26, %s1360_s25 }
  0x12   : > { %p53_p2 = scmp.eq.s32.totalorder %s1384_s8, 0  ;;  %p147_p5 = scmp.eq.s32.totalorder %s1062_s9, 3 }
  0x13   : > { %s1926_s11 = smov (%p34_p0, %s33_s11), 0  ;;  %s1928_s12 = smov (!%p34_p0, %s36_s12), %s1380_s30 }
  0x14   : > { %1903 = sst [smem:[#allocation9_spill]] %s1926_s11  ;;  %s41_s13 = ssub.s32 %s1376_s29, %s1926_s11 }
  0x15   : > { %p1487_p3 = por %p53_p2, %p52_p1  ;;  %p38_p4 = scmp.ge.s32.totalorder %s1928_s12, 2 }
  0x16   : > { %p152_p6 = scmp.ne.s32.totalorder %s1360_s25, %s1356_s24  ;;  %p153_p7 = scmp.eq.s32.totalorder %s1063_s10, 3 }
  0x17   : > { %s1930_s12 = smov (%p38_p4, %s1928_s12), 0  ;;  %p1495_p8 = por %p147_p5, %p52_p1 }
  0x18   : > { %1905 = sst [smem:[#allocation10_spill]] %s1930_s12  ;;  %p1499_p9 = por %p153_p7, %p152_p6 }
  0x19   : > { %s40_s17 = ssub.s32 %s1380_s30, %s1930_s12  ;;  %s45_s19 = sadd.s32 1, %s1364_s26 }
  0x1a   : > { %s42_s18 = sor.u32 %s41_s13, %s40_s17  ;;  %p1065_p11 = scmp.ge.s32.totalorder %s1384_s8, 4 }
  0x1b   : > { %p43_p10 = scmp.eq.s32.totalorder %s42_s18, 0 }
  0x1c   : > { %258 = sbr.rel (%p1065_p11) target bundleno = 45 (0x2d), region = 28 }
  0x1d   : > { %s1507_s20 = scalar_select %p43_p10, %s1364_s26, %s45_s19  }
  0x21   : > { %261 = sbr.rel (!%p1487_p3) target bundleno = 45 (0x2d), region = 32  ;;  %s263_s21 = sand.u32 (%p1487_p3), 1, %s1364_s26  }
  0x22   : > { %s1067_s22 = sshll.u32 (%p1487_p3), %s1380_s30, 3  ;;  %s1066_s23 = sshll.u32 (%p1487_p3), %s263_s21, 5 }
  0x23   : > { %s267_s9 = sadd.s32 (%p1487_p3), %s1376_s29, %s1067_s22  ;;  %s1908_s0 = sld [smem:[#allocation11_spill]] (%p1487_p3) }
  0x24   : > { %s1068_s10 = sshll.u32 (%p1487_p3), %s267_s9, 3  ;;  %s265_s18 = scalar_lea.vmem (%p1487_p3), [#allocation2], %s1066_s23 }
  0x29   : > { %s269_s17 = scalar_lea.vmem %s1908_s0, %s1068_s10 }
  0x2a   : > { %v304_v0 = vld [vmem:[%s269_s17] sm:$0xff]  ;;  %v306_v1 = vld [vmem:[%s269_s17 + $0x10] sm:$0xff] }
  0x2b   : > { %v308_v2 = vld [vmem:[%s269_s17 + $0x20] sm:$0xff]  ;;  %305 = vst [vmem:[%s265_s18] sm:$0xff] %v304_v0  ;;  %307 = vst [vmem:[%s265_s18 + $0x8] sm:$0xff] %v306_v1  ;;  %v310_v3 = vld [vmem:[%s269_s17 + $0x30] sm:$0xff] }
  0x2c   : > { %309 = vst [vmem:[%s265_s18 + $0x10] sm:$0xff] %v308_v2  ;;  %311 = vst [vmem:[%s265_s18 + $0x18] sm:$0xff] %v310_v3 }
  0x2d PF: > { %p1069_p12 = scmp.ge.s32.totalorder %s1384_s8, 1  ;;  %p316_p13 = scmp.lt.s32.totalorder %s1384_s8, 5 }
  0x2f   : > { %p317_p0 = pnand %p1069_p12, %p316_p13 }
  0x30   : > { %s1521_s12 = sand.u32 (!%p317_p0), 1, %s1360_s25   ;;  %p366_p1 = scmp.lt.s32.totalorder (!%p317_p0), %s1372_s28, 1 }
  0x31   : > { %320 = sbr.rel (%p317_p0) target bundleno = 710 (0x2c6), region = 70  ;;  %s1070_s14 = sshll.u32 (!%p317_p0), %s1521_s12, 5 }
  0x32   : > { %s1909_s6 = sld [smem:[#allocation16_spill]] (!%p317_p0)  ;;  %s1536_s18 = scalar_lea.vmem (!%p317_p0), [#allocation2], %s1070_s14 }
  0x33   : > { %s1910_s7 = sld [smem:[#allocation17_spill]] (!%p317_p0)  ;;  %s1538_s0 = scalar_lea.vmem (!%p317_p0), [#allocation3], %s1070_s14 }
  0x34   : > { %s1895_s11 = scalar_lea.vmem (!%p317_p0), [#allocation5], %s1521_s12  ;;  %p1074_p2 = scmp.ne.s32.totalorder (!%p317_p0), %s1368_s27, 0 }
  0x36   : > { %s367_s19 = scalar_select %p366_p1, %s1372_s28, 1 }
  0x37   : > { %377 = sbr.rel (%p1074_p2) target bundleno = 66 (0x42), region = 78 }
  0x38   : > { %s1529_s23 = scalar_lea.vmem %s1909_s6, %s367_s19  ;;  %s1110_s9 = sshll.u32 %s367_s19, 6 }
  0x39   : > { %s1534_s17 = scalar_lea.vmem %s1910_s7, %s1110_s9 }
  0x3c   : > { %vm378_vm0 = vcmask 0   ;;  %vm380_vm1 = vcmask 7168   ;;  %v1386_v4 = vmov 0.0  }
  0x3d   : > { %379 = vst.msk [vmem:[%s1529_s23] sm:$0x1] %vm378_vm0, %v1386_v4 }
  0x3e   : > { %381 = vst.msk [vmem:[%s1534_s17] sm:$0xff] %vm380_vm1, %v1386_v4  ;;  %382 = vst.msk [vmem:[%s1534_s17 + $0x8] sm:$0xff] %vm380_vm1, %v1386_v4 }
  0x3f   : > { %383 = vst.msk [vmem:[%s1534_s17 + $0x10] sm:$0xff] %vm380_vm1, %v1386_v4  ;;  %384 = vst.msk [vmem:[%s1534_s17 + $0x18] sm:$0xff] %vm380_vm1, %v1386_v4 }
  0x40   : > { %385 = vst.msk [vmem:[%s1534_s17 + $0x20] sm:$0xff] %vm380_vm1, %v1386_v4  ;;  %386 = vst.msk [vmem:[%s1534_s17 + $0x28] sm:$0xff] %vm380_vm1, %v1386_v4 }
  0x41   : > { %387 = vst.msk [vmem:[%s1534_s17 + $0x30] sm:$0xff] %vm380_vm1, %v1386_v4  ;;  %388 = vst.msk [vmem:[%s1534_s17 + $0x38] sm:$0xff] %vm380_vm1, %v1386_v4 }
  0x42 PF: > { %v1552_v5 = vld [vmem:[%s1536_s18 + $0x18] sm:$0xff]  ;;  %v1555_v6 = vld [vmem:[%s1536_s18 + $0x10] sm:$0xff]  ;;  %vm413_vm2 = vcmask 261120   ;;  %s1911_s1 = sld [smem:[#allocation12_spill]]  ;;  %v1387_v8 = vmov 0   ;;  %v1563_v9 = vld [vmem:[%s1536_s18 + $0x8] sm:$0xff]  ;;  %v599_v3 = vlaneseq }
  0x43   : > { %1135 = vmatprep.subr.mxu0 %v1552_v5  ;;  %1261 = vset.pattern.permute.xlu1 %v1387_v8  ;;  %v1569_v10 = vld [vmem:[%s1536_s18] sm:$0xff]  ;;  %s1912_s3 = sld [smem:[#allocation14_spill]]  ;;  %vm684_vm3 = vcmask 523264   ;;  %s1104_s18 = sshll.u32 %s1372_s28, 3 }
  0x44   : > { %1136 = vmatpush3.msra.mxu0 %v1552_v5  ;;  %1260 = vset.pattern.permute.xlu0 %v1387_v8  ;;  %s1913_s2 = sld [smem:[#allocation13_spill]]  ;;  %v1631_v8 = vshrl.u32 %v599_v3, 7  ;;  %s1106_s19 = sshll.u32 %s1372_s28, 1 }
  0x45   : > { %1137 = vmatprep.subr.mxu0 %v1555_v6  ;;  %s881_s21 = sadd.s32 %s1368_s27, %s1104_s18  ;;  %s1779_s22 = sadd.s32 %s1368_s27, %s1106_s19 }
  0x46   : > { %1138 = vmatpush3.msra.mxu0 %v1555_v6  ;;  %s1105_s9 = sshll.u32 %s881_s21, 7  ;;  %s1914_s4 = sld [smem:[#allocation15_spill]] }
  0x47   : > { %1139 = vmatprep.subr.mxu0 %v1563_v9  ;;  %s1390_s27 = smov [#allocation3]  }
  0x48   : > { %v393_v7 = vld [vmem:[%s1911_s1] sm:$0xff]  ;;  %1140 = vmatpush3.msra.mxu0 %v1563_v9  ;;  %v394_v13 = vld [vmem:[%s1911_s1 + $0x8] sm:$0xff]  ;;  %v395_v15 = vld [vmem:[%s1911_s1 + $0x10] sm:$0xff]  ;;  %s1266_s28 = sshll.u32 %s1390_s27, 4  ;;  %s1267_s28 = int_to_ptr.vmem [resolvable:$false] %s1266_s28 }
  0x49   : > { %1143 = vmatprep.mubr.msk.f32.mxu0 %vm413_vm2, %v393_v7  ;;  %v407_v11 = vld [vmem:[%s1912_s3 + $0x10] sm:$0xff]  ;;  %v405_v12 = vld [vmem:[%s1912_s3] sm:$0xff]  ;;  %v408_v14 = vld [vmem:[%s1912_s3 + $0x18] sm:$0xff]  ;;  %1141 = vmatprep.subr.mxu0 %v1569_v10  ;;  %s1268_s18 = scalar_lea.vmem %s1267_s28, 1024 }
  0x4a   : > { %563 = vperm.xlu1 %1261, %v407_v11   ;;  %553 = vperm.xlu0 %1260, %v405_v12   ;;  %v406_v16 = vld [vmem:[%s1912_s3 + $0x8] sm:$0xff]  ;;  %v396_v17 = vld [vmem:[%s1911_s1 + $0x18] sm:$0xff]  ;;  %v397_v19 = vld [vmem:[%s1911_s1 + $0x20] sm:$0xff] }
  0x4b   : > { %1142 = vmatpush3.msra.mxu0 %v1569_v10  ;;  %v410_v18 = vld [vmem:[%s1912_s3 + $0x28] sm:$0xff]  ;;  %v409_v20 = vld [vmem:[%s1912_s3 + $0x20] sm:$0xff]  ;;  %v412_v22 = vld [vmem:[%s1912_s3 + $0x38] sm:$0xff] }
  0x4c   : > { %1144 = vmatmul.mubr.msk.f32.vlgmr.msra.gmra.mxu0 %vm413_vm2, %v394_v13  ;;  %v398_v21 = vld [vmem:[%s1911_s1 + $0x28] sm:$0xff]  ;;  %v399_v23 = vld [vmem:[%s1911_s1 + $0x30] sm:$0xff]  ;;  %v400_v25 = vld [vmem:[%s1911_s1 + $0x38] sm:$0xff]  ;;  %v1634_v13 = vadd.s32 16, %v1631_v8  ;;  %s1784_s14 = scalar_lea.hbm %s1914_s4, %s1105_s9  ;;  %s858_s1 = scalar_lea.sflag [#allocation4], %s1521_s12 }
  0x4d   : > { %1146 = vmatprep.mubr.msk.f32.mxu0 %vm413_vm2, %v395_v15  ;;  %v411_v24 = vld [vmem:[%s1912_s3 + $0x30] sm:$0xff]  ;;  %v401_v26 = vld [vmem:[%s1913_s2] sm:$0xff] }
  0x4e   : > { %568 = vperm.xlu1 %1261, %v408_v14   ;;  %558 = vperm.xlu0 %1260, %v406_v16   ;;  %v1637_v14 = vadd.s32 48, %v1631_v8  ;;  %v1640_v16 = vadd.s32 8, %v1631_v8 }
  0x4f   : > { %1171 = vmatprep.mubr.msk.f32.mxu1 %vm684_vm3, %v401_v26 }
  0x50   : > { %1147 = vmatmul.mubr.msk.f32.gmra.mxu0 %vm413_vm2, %v396_v17  ;;  %v1643_v17 = vadd.s32 24, %v1631_v8 }
  0x51   : > { %1149 = vmatprep.mubr.msk.f32.mxu0 %vm413_vm2, %v397_v19  ;;  %v1649_v19 = vadd.s32 40, %v1631_v8 }
  0x52   : > { %578 = vperm.xlu1 %1261, %v410_v18   ;;  %573 = vperm.xlu0 %1260, %v409_v20   ;;  %v1646_v18 = vadd.s32 32, %v1631_v8  ;;  %v1652_v20 = vadd.s32 56, %v1631_v8 }
  0x54   : > { %1150 = vmatmul.mubr.msk.f32.gmra.mxu0 %vm413_vm2, %v398_v21 }
  0x55   : > { %1152 = vmatprep.mubr.msk.f32.mxu0 %vm413_vm2, %v399_v23 }
  0x56   : > { %588 = vperm.xlu1 %1261, %v412_v22   ;;  %583 = vperm.xlu0 %1260, %v411_v24  }
  0x58   : > { %1153 = vmatmul.mubr.msk.f32.gmra.mxu0 %vm413_vm2, %v400_v25 }
  0xc5   : > { %v564_v27 = vpop.permute.xlu1 %563  ;;  %v554_v28 = vpop.permute.xlu0 %553 }
  0xc9   : > { %v569_v30 = vpop.permute.xlu1 %568  ;;  %v559_v32 = vpop.permute.xlu0 %558 }
  0xcd   : > { %v579_v35 = vpop.permute.xlu1 %578  ;;  %v574_v37 = vpop.permute.xlu0 %573 }
  0xd1   : > { %v589_v48 = vpop.permute.xlu1 %588  ;;  %v584_v55 = vpop.permute.xlu0 %583 }
 0x10c   : > { %v1145_v29 = vpop.f32.mrf.mxu0 }
 0x10d   : > { %v544_v42 = vmul.f32 2.0, %v1145_v29 }
 0x10e   : > { %v504_v31 = vpop.f32.mrf.mxu0 }
 0x10f   : > { %v543_v39 = vmul.f32 2.0, %v504_v31  ;;  %v592_v54 = vsub.f32 %v559_v32, %v544_v42  ;;  %v1388_v42 = vmov 1.0  }
 0x110   : > { %v1148_v33 = vpop.f32.mrf.mxu0 }
 0x111   : > { %v546_v44 = vmul.f32 2.0, %v1148_v33  ;;  %v591_v50 = vsub.f32 %v554_v28, %v543_v39 }
 0x112   : > { %v514_v34 = vpop.f32.mrf.mxu0 }
 0x113   : > { %v545_v45 = vmul.f32 2.0, %v514_v34  ;;  %v594_v56 = vsub.f32 %v569_v30, %v546_v44  ;;  %v403_v44 = vld [vmem:[%s1913_s2 + $0x10] sm:$0xff] }
 0x114   : > { %v1151_v36 = vpop.f32.mrf.mxu0 }
 0x115   : > { %v548_v40 = vmul.f32 2.0, %v1151_v36  ;;  %v593_v57 = vsub.f32 %v564_v27, %v545_v45  ;;  %v404_v45 = vld [vmem:[%s1913_s2 + $0x18] sm:$0xff] }
 0x116   : > { %v524_v38 = vpop.f32.mrf.mxu0 }
 0x117   : > { %v547_v41 = vmul.f32 2.0, %v524_v38  ;;  %v596_v51 = vsub.f32 %v579_v35, %v548_v40 }
 0x118   : > { %v1154_v43 = vpop.f32.mrf.mxu0 }
 0x119   : > { %v595_v46 = vsub.f32 %v574_v37, %v547_v41  ;;  %v550_v47 = vmul.f32 2.0, %v1154_v43  ;;  %v609_v60 = vmin.f32 %v592_v54, %v596_v51  ;;  %v402_v43 = vld [vmem:[%s1913_s2 + $0x8] sm:$0xff] }
 0x11a   : > { %v534_v49 = vpop.f32.mrf.mxu0 }
 0x11b   : > { %v598_v52 = vsub.f32 %v589_v48, %v550_v47  ;;  %v549_v53 = vmul.f32 2.0, %v534_v49  ;;  %v608_v58 = vmin.f32 %v591_v50, %v595_v46 }
 0x11d   : > { %v597_v59 = vsub.f32 %v584_v55, %v549_v53  ;;  %v611_v61 = vmin.f32 %v594_v56, %v598_v52  ;;  %v612_v63 = vmin.f32 %v608_v58, %v609_v60 }
 0x11f   : > { %v610_v62 = vmin.f32 %v593_v57, %v597_v59 }
 0x121   : > { %v613_v0 = vmin.f32 %v610_v62, %v611_v61 }
 0x123   : > { %v614_v1 = vmin.f32 %v612_v63, %v613_v0 }
 0x125   : > { %v615_v2 = vrot.slane %v614_v1, 4 }
 0x127   : > { %v616_v4 = vmin.f32 %v614_v1, %v615_v2 }
 0x129   : > { %v617_v7 = vrot.slane %v616_v4, 2 }
 0x12b   : > { %v618_v11 = vmin.f32 %v616_v4, %v617_v7 }
 0x12d   : > { %v619_v12 = vrot.slane %v618_v11, 1 }
 0x12f   : > { %v620_v15 = vmin.f32 %v618_v11, %v619_v12 }
 0x131   : > { %vm623_vm4 = vcmp.eq.f32.partialorder %v593_v57, %v620_v15  ;;  %vm627_vm5 = vcmp.eq.f32.partialorder %v597_v59, %v620_v15  ;;  %vm621_vm6 = vcmp.eq.f32.partialorder %v591_v50, %v620_v15  ;;  %vm622_vm7 = vcmp.eq.f32.partialorder %v592_v54, %v620_v15 }
 0x132   : > { %v631_v21 = vsel %vm623_vm4, %v1634_v13, 64  ;;  %v635_v22 = vsel %vm627_vm5, %v1637_v14, 64  ;;  %vm624_vm8 = vcmp.eq.f32.partialorder %v594_v56, %v620_v15  ;;  %vm625_vm9 = vcmp.eq.f32.partialorder %v595_v46, %v620_v15 }
 0x133   : > { %vm641_vm10 = vcmp.lt.s32.totalorder %v631_v21, %v635_v22  ;;  %vm626_vm11 = vcmp.eq.f32.partialorder %v596_v51, %v620_v15  ;;  %vm628_vm12 = vcmp.eq.f32.partialorder %v598_v52, %v620_v15  ;;  %v629_v23 = vsel %vm621_vm6, %v1631_v8, 64 }
 0x134   : > { %v630_v24 = vsel %vm622_vm7, %v1640_v16, 64  ;;  %v632_v25 = vsel %vm624_vm8, %v1643_v17, 64  ;;  %v633_v26 = vsel %vm625_vm9, %v1646_v18, 64  ;;  %v642_v27 = vsel %vm641_vm10, %v631_v21, %v635_v22 }
 0x135   : > { %v634_v28 = vsel %vm626_vm11, %v1649_v19, 64  ;;  %v636_v29 = vsel %vm628_vm12, %v1652_v20, 64  ;;  %vm637_vm13 = vcmp.lt.s32.totalorder %v629_v23, %v633_v26  ;;  %v1389_v56 = vmov 0.0  }
 0x136   : > { %v638_v30 = vsel %vm637_vm13, %v629_v23, %v633_v26  ;;  %vm639_vm14 = vcmp.lt.s32.totalorder %v630_v24, %v634_v28  ;;  %vm643_vm15 = vcmp.lt.s32.totalorder %v632_v25, %v636_v29 }
 0x137   : > { %v640_v31 = vsel %vm639_vm14, %v630_v24, %v634_v28  ;;  %v644_v32 = vsel %vm643_vm15, %v632_v25, %v636_v29 }
 0x138   : > { %vm645_vm0 = vcmp.lt.s32.totalorder %v638_v30, %v640_v31  ;;  %vm647_vm1 = vcmp.lt.s32.totalorder %v642_v27, %v644_v32 }
 0x139   : > { %v646_v33 = vsel %vm645_vm0, %v638_v30, %v640_v31  ;;  %v648_v34 = vsel %vm647_vm1, %v642_v27, %v644_v32 }
 0x13a   : > { %vm649_vm2 = vcmp.lt.s32.totalorder %v646_v33, %v648_v34 }
 0x13b   : > { %v650_v35 = vsel %vm649_vm2, %v646_v33, %v648_v34 }
 0x13c   : > { %v651_v36 = vrot.slane %v650_v35, 4 }
 0x13e   : > { %vm652_vm4 = vcmp.lt.s32.totalorder %v650_v35, %v651_v36 }
 0x13f   : > { %v653_v37 = vsel %vm652_vm4, %v650_v35, %v651_v36 }
 0x140   : > { %v654_v38 = vrot.slane %v653_v37, 2 }
 0x142   : > { %vm655_vm5 = vcmp.lt.s32.totalorder %v653_v37, %v654_v38 }
 0x143   : > { %v656_v39 = vsel %vm655_vm5, %v653_v37, %v654_v38 }
 0x144   : > { %v657_v40 = vrot.slane %v656_v39, 1 }
 0x146   : > { %vm658_vm6 = vcmp.lt.s32.totalorder %v656_v39, %v657_v40 }
 0x147   : > { %v1662_v41 = vsel %vm658_vm6, %v656_v39, %v657_v40 }
 0x148   : > { %vm667_vm7 = vcmp.eq.s32.totalorder %v1652_v20, %v1662_v41  ;;  %786 = vst [vmem:[%s1895_s11] sm:$0x1] %v1662_v41  ;;  %vm666_vm8 = vcmp.eq.s32.totalorder %v1637_v14, %v1662_v41  ;;  %vm665_vm9 = vcmp.eq.s32.totalorder %v1649_v19, %v1662_v41  ;;  %vm664_vm10 = vcmp.eq.s32.totalorder %v1646_v18, %v1662_v41  ;;  %s884_s11 = sshll.u32 %s1538_s0, 4  ;;  %s1787_s11 = int_to_ptr.vmem [resolvable:$true] %s884_s11 }
 0x149   : > { %1155 = vmatprep.subr.msk.mxu1 %vm667_vm7, %v1388_v42  ;;  %vm663_vm11 = vcmp.eq.s32.totalorder %v1643_v17, %v1662_v41  ;;  %vm662_vm12 = vcmp.eq.s32.totalorder %v1634_v13, %v1662_v41  ;;  %vm661_vm13 = vcmp.eq.s32.totalorder %v1640_v16, %v1662_v41  ;;  %vm660_vm14 = vcmp.eq.s32.totalorder %v1631_v8, %v1662_v41  ;;  %s1262_s2 = scalar_lea.vmem %s1787_s11, 512  ;;  %p1269_p6 = scmp.lt.s32.totalorder %s1787_s11, %s1267_s28 }
 0x14a   : > { %1156 = vmatpush3.msk.msra.mxu1 %vm667_vm7, %v1388_v42  ;;  %v1087_v58 = vsel %vm664_vm10, 1.0, %v1389_v56  ;;  %v1089_v59 = vsel %vm666_vm8, 1.0, %v1389_v56  ;;  %v1086_v60 = vsel %vm663_vm11, 1.0, %v1389_v56  ;;  %v1088_v61 = vsel %vm665_vm9, 1.0, %v1389_v56  ;;  %p1263_p3 = scmp.ne.s32.totalorder %s1787_s11, %s1262_s2  ;;  %p1270_p7 = scmp.lt.s32.totalorder %s1268_s18, %s1262_s2 }
 0x14b   : > { %1157 = vmatprep.subr.msk.mxu1 %vm666_vm8, %v1388_v42  ;;  %v1090_v62 = vsel %vm667_vm7, 1.0, %v1389_v56 }
 0x14c   : > { %1158 = vmatpush3.msk.msra.mxu1 %vm666_vm8, %v1388_v42  ;;  %p1264_p4 = pnand %p1263_p3, %p1495_p8  ;;  %p1271_p10 = por %p1270_p7, %p1269_p6 }
 0x14d   : > { %1159 = vmatprep.subr.msk.mxu1 %vm665_vm9, %v1388_v42 }
 0x14e   : > { %1160 = vmatpush3.msk.msra.mxu1 %vm665_vm9, %v1388_v42  ;;  %p1265_p5 = pneg %p1264_p4 }
 0x14f   : > { %1161 = vmatprep.subr.msk.mxu1 %vm664_vm10, %v1388_v42 }
 0x150   : > { %1162 = vmatpush3.msk.msra.mxu1 %vm664_vm10, %v1388_v42  ;;  %p1272_p11 = pnand %p1271_p10, %p1265_p5 }
 0x151   : > { %1163 = vmatprep.subr.msk.mxu1 %vm663_vm11, %v1388_v42 }
 0x152   : > { %1164 = vmatpush3.msk.msra.mxu1 %vm663_vm11, %v1388_v42 }
 0x153   : > { %1165 = vmatprep.subr.msk.mxu1 %vm662_vm12, %v1388_v42 }
 0x154   : > { %1166 = vmatpush3.msk.msra.mxu1 %vm662_vm12, %v1388_v42 }
 0x155   : > { %1167 = vmatprep.subr.msk.mxu1 %vm661_vm13, %v1388_v42 }
 0x156   : > { %1168 = vmatpush3.msk.msra.mxu1 %vm661_vm13, %v1388_v42 }
 0x157   : > { %1169 = vmatprep.subr.msk.mxu1 %vm660_vm14, %v1388_v42 }
 0x158   : > { %1170 = vmatpush3.msk.msra.mxu1 %vm660_vm14, %v1388_v42 }
 0x159   : > { %1172 = vmatmul.mubr.msk.f32.vlgmr.msra.gmra.mxu1 %vm684_vm3, %v402_v43 }
 0x15a   : > { %1174 = vmatprep.mubr.msk.f32.mxu1 %vm684_vm3, %v403_v44 }
 0x15d   : > { %1175 = vmatmul.mubr.msk.f32.gmra.mxu1 %vm684_vm3, %v404_v45 }
 0x219   : > { %v1173_v46 = vpop.f32.mrf.mxu1 }
 0x21a   : > { %783 = vst [vmem:[%s1538_s0 + $0x8] sm:$0xff] %v1173_v46  ;;  %v788_v47 = vsub.f32 %v1173_v46, %v1563_v9  ;;  %v1083_v9 = vsel %vm660_vm14, 1.0, %v1389_v56 }
 0x21b   : > { %v763_v48 = vpop.f32.mrf.mxu1 }
 0x21c   : > { %782 = vst [vmem:[%s1538_s0] sm:$0xff] %v763_v48  ;;  %v787_v49 = vsub.f32 %v763_v48, %v1569_v10  ;;  %v792_v50 = vmul.f32 %v788_v47, %v788_v47  ;;  %v1085_v10 = vsel %vm662_vm12, 1.0, %v1389_v56 }
 0x21d   : > { %v1176_v51 = vpop.f32.mrf.mxu1 }
 0x21e   : > { %785 = vst [vmem:[%s1538_s0 + $0x18] sm:$0xff] %v1176_v51  ;;  %v790_v52 = vsub.f32 %v1176_v51, %v1552_v5  ;;  %797 = vadd.xlane.f32.xlu1 %v792_v50  ;;  %v791_v53 = vmul.f32 %v787_v49, %v787_v49 }
 0x21f   : > { %v773_v54 = vpop.f32.mrf.mxu1 }
 0x220   : > { %784 = vst [vmem:[%s1538_s0 + $0x10] sm:$0xff] %v773_v54  ;;  %795 = vadd.xlane.f32.xlu0 %v791_v53  ;;  %v794_v55 = vmul.f32 %v790_v52, %v790_v52  ;;  %v789_v57 = vsub.f32 %v773_v54, %v1555_v6  ;;  %v1084_v6 = vsel %vm661_vm13, 1.0, %v1389_v56 }
 0x222   : > { %824 = vadd.xlane.f32.xlu1 %v1083_v9  ;;  %v793_v5 = vmul.f32 %v789_v57, %v789_v57 }
 0x224   : > { %801 = vadd.xlane.f32.xlu0 %v794_v55 }
 0x226   : > { %828 = vadd.xlane.f32.xlu1 %v1085_v10 }
 0x228   : > { %799 = vadd.xlane.f32.xlu0 %v793_v5 }
 0x22a   : > { %832 = vadd.xlane.f32.xlu1 %v1087_v58 }
 0x22c   : > { %826 = vadd.xlane.f32.xlu0 %v1084_v6 }
 0x22e   : > { %836 = vadd.xlane.f32.xlu1 %v1089_v59 }
 0x230   : > { %830 = vadd.xlane.f32.xlu0 %v1086_v60 }
 0x234   : > { %834 = vadd.xlane.f32.xlu0 %v1088_v61 }
 0x238   : > { %838 = vadd.xlane.f32.xlu0 %v1090_v62 }
 0x239   : > { %1275 = shalt.err (!%p1272_p11)
}
 0x23a   : > { %s1276_s0 = scalar_lea.hbm %s1784_s14, 512  ;;  %s1280_s9 = scalar_lea.hbm %s1914_s4, 2048 }
 0x23b   : > { %p1277_p12 = scmp.ne.s32.totalorder %s1784_s14, %s1276_s0  ;;  %p1281_p1 = scmp.lt.s32.totalorder %s1784_s14, %s1914_s4 }
 0x23c   : > { %p1282_p2 = scmp.lt.s32.totalorder %s1280_s9, %s1276_s0 }
 0x23d   : > { %p1278_p13 = pnand %p1277_p12, %p1495_p8 }
 0x23e   : > { %p1283_p3 = por %p1282_p2, %p1281_p1 }
 0x23f   : > { %p1279_p0 = pneg %p1278_p13 }
 0x241   : > { %p1284_p4 = pnand %p1283_p3, %p1279_p0 }
 0x243   : > { %1287 = shalt.err (!%p1284_p4)
}
 0x244   : > { %s1391_s2 = smov 128   ;;  %s1392_s27 = smov 256  }
 0x245   : > { %s1393_s28 = smov 8   ;;  %s1107_s18 = sshll.u32 %s1779_s22, 4 }
 0x246   : > { %1177 = dma.vmem_to_hbm [thread:$0]  (%p1495_p8), %s1787_s11, 512, %s1784_s14, %s858_s1, %s1391_s2, %s1392_s27, %s1393_s28  }
 0x247   : > { %s900_s21 = scalar_lea.hbm %s1890_s5, %s1107_s18  ;;  %s1915_s9 = scalar_lea.vmem [#allocation5], %s1521_s12 }
 0x248   : > { %s902_s10 = sshll.u32 %s1915_s9, 4  ;;  %s863_s13 = scalar_lea.sflag [#allocation6], %s1521_s12  ;;  %s903_s10 = int_to_ptr.vmem [resolvable:$true] %s902_s10 }
 0x249   : > { %s1288_s3 = scalar_lea.vmem %s903_s10, 16  ;;  %s1394_s4 = smov [#allocation5]  }
 0x24a   : > { %p1289_p5 = scmp.ne.s32.totalorder %s903_s10, %s1288_s3  ;;  %s1292_s6 = sshll.u32 %s1394_s4, 4  ;;  %s1293_s6 = int_to_ptr.vmem [resolvable:$false] %s1292_s6 }
 0x24b   : > { %s1294_s7 = scalar_lea.vmem %s1293_s6, 32  ;;  %p1295_p10 = scmp.lt.s32.totalorder %s903_s10, %s1293_s6 }
 0x24c   : > { %p1290_p6 = pnand %p1289_p5, %p1495_p8  ;;  %p1296_p11 = scmp.lt.s32.totalorder %s1294_s7, %s1288_s3 }
 0x24e   : > { %p1291_p7 = pneg %p1290_p6  ;;  %p1297_p12 = por %p1296_p11, %p1295_p10 }
 0x250   : > { %p1298_p13 = pnand %p1297_p12, %p1291_p7 }
 0x252   : > { %1301 = shalt.err (!%p1298_p13)
}
 0x253   : > { %s1302_s1 = scalar_lea.hbm %s900_s21, 16  ;;  %s1306_s22 = scalar_lea.hbm %s1890_s5, 64 }
 0x254   : > { %p1303_p0 = scmp.ne.s32.totalorder %s900_s21, %s1302_s1  ;;  %p1307_p3 = scmp.lt.s32.totalorder %s900_s21, %s1890_s5 }
 0x255   : > { %p1308_p4 = scmp.lt.s32.totalorder %s1306_s22, %s1302_s1 }
 0x256   : > { %p1304_p1 = pnand %p1303_p0, %p1495_p8 }
 0x257   : > { %p1309_p5 = por %p1308_p4, %p1307_p3 }
 0x258   : > { %p1305_p2 = pneg %p1304_p1 }
 0x25a   : > { %p1310_p6 = pnand %p1309_p5, %p1305_p2 }
 0x25c   : > { %1313 = shalt.err (!%p1310_p6)
}
 0x25d   : > { %1178 = dma.vmem_to_hbm [thread:$0]  (%p1495_p8), %s903_s10, 16, %s900_s21, %s863_s13   ;;  %v816_v1 = vld [vmem:[%s1534_s17] sm:$0xff]  ;;  %vm848_vm3 = vcmask 7168   ;;  %v818_v7 = vld [vmem:[%s1534_s17 + $0x10] sm:$0xff]  ;;  %v817_v17 = vld [vmem:[%s1534_s17 + $0x8] sm:$0xff]  ;;  %vm814_vm15 = vcmask 0  }
 0x25e   : > { %v820_v14 = vld [vmem:[%s1534_s17 + $0x20] sm:$0xff]  ;;  %v822_v21 = vld [vmem:[%s1534_s17 + $0x30] sm:$0xff]  ;;  %v819_v25 = vld [vmem:[%s1534_s17 + $0x18] sm:$0xff] }
 0x25f   : > { %v821_v31 = vld [vmem:[%s1534_s17 + $0x28] sm:$0xff]  ;;  %v812_v36 = vld [vmem:[%s1529_s23] sm:$0x1]  ;;  %v823_v37 = vld [vmem:[%s1534_s17 + $0x38] sm:$0xff] }
 0x2a7   : > { %v798_v63 = vpop.xlane.xlu1 %797 }
 0x2a9   : > { %v796_v0 = vpop.xlane.xlu0 %795 }
 0x2aa   : > { %v803_v11 = vadd.f32 %v798_v63, %v796_v0 }
 0x2ab   : > { %v825_v2 = vpop.xlane.xlu1 %824 }
 0x2ac   : > { %v840_v3 = vadd.f32 %v825_v2, %v816_v1 }
 0x2ad   : > { %v802_v4 = vpop.xlane.xlu0 %801 }
 0x2ae   : > { %849 = vst.msk [vmem:[%s1534_s17] sm:$0xff] %vm848_vm3, %v840_v3 }
 0x2af   : > { %v829_v8 = vpop.xlane.xlu1 %828 }
 0x2b0   : > { %v842_v12 = vadd.f32 %v829_v8, %v818_v7 }
 0x2b1   : > { %v800_v13 = vpop.xlane.xlu0 %799 }
 0x2b2   : > { %851 = vst.msk [vmem:[%s1534_s17 + $0x10] sm:$0xff] %vm848_vm3, %v842_v12  ;;  %v804_v15 = vadd.f32 %v803_v11, %v800_v13 }
 0x2b3   : > { %v833_v16 = vpop.xlane.xlu1 %832 }
 0x2b4   : > { %v805_v18 = vadd.f32 %v804_v15, %v802_v4  ;;  %v844_v19 = vadd.f32 %v833_v16, %v820_v14 }
 0x2b5   : > { %v827_v20 = vpop.xlane.xlu0 %826 }
 0x2b6   : > { %v806_v22 = vrot.slane %v805_v18, 4  ;;  %853 = vst.msk [vmem:[%s1534_s17 + $0x20] sm:$0xff] %vm848_vm3, %v844_v19  ;;  %v841_v23 = vadd.f32 %v827_v20, %v817_v17 }
 0x2b7   : > { %v837_v24 = vpop.xlane.xlu1 %836 }
 0x2b8   : > { %v807_v26 = vadd.f32 %v806_v22, %v805_v18  ;;  %850 = vst.msk [vmem:[%s1534_s17 + $0x8] sm:$0xff] %vm848_vm3, %v841_v23  ;;  %v846_v27 = vadd.f32 %v837_v24, %v822_v21 }
 0x2b9   : > { %v831_v28 = vpop.xlane.xlu0 %830 }
 0x2ba   : > { %v808_v29 = vrot.slane %v807_v26, 2  ;;  %855 = vst.msk [vmem:[%s1534_s17 + $0x30] sm:$0xff] %vm848_vm3, %v846_v27  ;;  %v843_v30 = vadd.f32 %v831_v28, %v819_v25 }
 0x2bc   : > { %v809_v32 = vadd.f32 %v808_v29, %v807_v26  ;;  %852 = vst.msk [vmem:[%s1534_s17 + $0x18] sm:$0xff] %vm848_vm3, %v843_v30 }
 0x2bd   : > { %v835_v33 = vpop.xlane.xlu0 %834 }
 0x2be   : > { %v810_v34 = vrot.slane %v809_v32, 1  ;;  %v845_v35 = vadd.f32 %v835_v33, %v821_v31 }
 0x2c0   : > { %v811_v38 = vadd.f32 %v810_v34, %v809_v32  ;;  %854 = vst.msk [vmem:[%s1534_s17 + $0x28] sm:$0xff] %vm848_vm3, %v845_v35 }
 0x2c1   : > { %v839_v39 = vpop.xlane.xlu0 %838 }
 0x2c2   : > { %v813_v40 = vadd.f32 %v812_v36, %v811_v38  ;;  %v847_v41 = vadd.f32 %v839_v39, %v823_v37 }
 0x2c4   : > { %815 = vst.msk [vmem:[%s1529_s23] sm:$0x1] %vm814_vm15, %v813_v40 }
 0x2c5   : > { %856 = vst.msk [vmem:[%s1534_s17 + $0x38] sm:$0xff] %vm848_vm3, %v847_v41 }
 0x2c6 PF: > { %p1188_p8 = scmp.ge.s32.totalorder %s1384_s8, 2  ;;  %s920_s3 = sand.u32 1, %s1356_s24  }
 0x2c7   : > { %s921_s4 = scalar_lea.sflag [#allocation4], %s920_s3 }
 0x2c8   : > { %p1182_p7 = pnand %p1188_p8, %p1499_p9 }
 0x2ca   : > { %p1183_p10 = pneg %p1182_p7 }
 0x2cc   : > { %1347 = dma.done.wait (%p1183_p10), %s921_s4, 512  }
 0x2cd   : > { %1349 = vsyncadd (%p1183_p10), %s921_s4, 4294966784  ;;  %s930_s6 = scalar_lea.sflag [#allocation6], %s920_s3 }
 0x2ce   : > { %1351 = dma.done.wait (%p1183_p10), %s930_s6, 16  }
 0x2cf   : > { %1353 = vsyncadd (%p1183_p10), %s930_s6, 4294967280  ;;  %s24_s8 = sadd.s32 1, %s1384_s8   ;;  %s1916_s7 = sld [smem:[#allocation9_spill]] }
 0x2d0   : > { %p21_p11 = scmp.ge.s32.totalorder %s24_s8, 6   ;;  %s1917_s15 = sld [smem:[#allocation10_spill]] }
 0x2d1   : > { %s1918_s24 = smov %s1360_s25  ;;  %s1919_s25 = smov %s1364_s26 }
 0x2d2   : > { %s1920_s26 = smov %s1507_s20  ;;  %s1921_s27 = smov %s1376_s29 }
 0x2d3   : > { %s1922_s28 = smov %s1380_s30  ;;  %23 = sbr.rel (!%p21_p11) target bundleno = 15 (0xf), region = 159 }
 0x2d5   : > { %s1923_s29 = smov %s1916_s7 }
 0x2d6   : > { %s1924_s30 = smov %s1917_s15 }
 0x2d8   :  { %948 = vsyncpa [#allocation4], 1 }
 0x2d9   :  { %950 = vsyncpa [#allocation4 + $0x1], 1 }
 0x2da   :  { %951 = vsyncpa [#allocation6], 1 }
 0x2db   :  { %953 = vsyncpa [#allocation6 + $0x1], 1 }

</bundles_post_ra>
